<compile_context>
chip_gen: v5e
topology: v5e:2x2
jax: 0.10.0
libtpu: 0.0.40
codegen_flags: <defaults>
</compile_context>

<pallas_src>
import functools

import jax
import jax.numpy as jnp
from jax.experimental import pallas as pl
from jax.experimental.pallas import tpu as pltpu


# --------------------------------------------------------------------------- #
# Pallas kernel: elementwise affine forward transform (pure HBM streaming).
# --------------------------------------------------------------------------- #
def _affine_forward_kernel(x_ref, log_scale_ref, shift_ref, y_ref):
    # exp() on the resident (1, D) param rides the EUP slot — free under the DMA
    # bottleneck. Explicit cast so bf16/f16 outputs lower (expression promotes to f32).
    y_ref[...] = (x_ref[...] * jnp.exp(log_scale_ref[...])
                  + shift_ref[...]).astype(y_ref.dtype)


# --------------------------------------------------------------------------- #
# Generation-aware configuration (static, trace-time host query).
# --------------------------------------------------------------------------- #
def _chip_config():
    """Pick (x-tile target bytes, vmem limit override, dimension semantics)."""
    try:
        kind = jax.devices()[0].device_kind.lower()
    except Exception:  # pragma: no cover - defensive
        kind = ""
    if "v7" in kind or "7x" in kind:
        # 3.2 TB/s: 2 MiB steps leave ~25% per-step overhead. 8 MiB tiles →
        # 4× double-buffered footprint ≈ 32 MiB, so raise the scoped limit
        # (64 MiB physical). CORE_PARALLEL actually splits the grid across
        # the 2 TensorCores (plain "parallel" is a codegen no-op).
        return (8 << 20, 48 << 20, (pltpu.CORE_PARALLEL,))
    if "v6" in kind:
        # 4 MiB tiles → 16 MiB footprint, still under the 32 MiB default limit.
        return (4 << 20, None, ("parallel",))
    # v5e / unknown: 16 MiB default scoped VMEM → keep 2 MiB tiles, no override.
    return (2 << 20, None, ("parallel",))


def _pick_batch_tile(B, D, itemsize, target_bytes):
    """Largest sublane-aligned batch tile ~target_bytes of x per grid step."""
    sub = {4: 8, 2: 16, 1: 32}.get(itemsize, 8)  # dtype-aware sublane packing
    tb = max(sub, target_bytes // max(1, D * itemsize))
    if tb >= B:
        return B  # full-extent block: always legal regardless of alignment
    return max(sub, (tb // sub) * sub)


def _repack_lane_dense(x, log_scale, shift):
    """Present a lane-dense (last dim % 128 == 0) layout to the kernel."""
    B, D = x.shape
    if D % 128 == 0:
        return x, log_scale, shift, None
    if 128 % D == 0 and (B * D) % 128 == 0:
        # Fold rows: (B, D) -> (B*D//128, 128); params tile along lanes to match.
        reps = 128 // D
        return (x.reshape(B * D // 128, 128),
                jnp.tile(log_scale, reps),
                jnp.tile(shift, reps),
                ("reshape", (B, D)))
    # Zero-pad the feature dim to the next multiple of 128 (exp(0)=1, shift=0
    # keep the padded lanes inert; they are sliced off afterwards).
    Dp = ((D + 127) // 128) * 128
    pad = Dp - D
    return (jnp.pad(x, ((0, 0), (0, pad))),
            jnp.pad(log_scale, (0, pad)),
            jnp.pad(shift, (0, pad)),
            ("pad", (B, D)))


@functools.partial(jax.jit, static_argnames=("batch_tile",))
def affine_forward_transform(x, log_scale, shift, batch_tile=None):
    """Pallas-backed forward_transform. Returns (y, ldj, Jacob=None)."""
    B, D = x.shape
    target_bytes, vmem_limit, semantics = _chip_config()

    xp, lsp, shp, meta = _repack_lane_dense(x, log_scale, shift)
    Bp, Dp = xp.shape

    tb = batch_tile if batch_tile is not None else _pick_batch_tile(
        Bp, Dp, jnp.dtype(x.dtype).itemsize, target_bytes)
    tb = min(tb, Bp)
    grid = (pl.cdiv(Bp, tb),)

    cp_kwargs = dict(dimension_semantics=semantics)
    if vmem_limit is not None:
        cp_kwargs["vmem_limit_bytes"] = vmem_limit

    yp = pl.pallas_call(
        _affine_forward_kernel,
        out_shape=jax.ShapeDtypeStruct((Bp, Dp), x.dtype),
        grid=grid,
        in_specs=[
            pl.BlockSpec((tb, Dp), lambda i: (i, 0)),   # x: streamed batch tiles
            pl.BlockSpec((1, Dp), lambda i: (0, 0)),    # log_scale: resident
            pl.BlockSpec((1, Dp), lambda i: (0, 0)),    # shift: resident
        ],
        out_specs=pl.BlockSpec((tb, Dp), lambda i: (i, 0)),
        compiler_params=pltpu.CompilerParams(**cp_kwargs),
    )(xp, lsp.reshape(1, Dp).astype(jnp.float32), shp.reshape(1, Dp).astype(jnp.float32))

    if meta is None:
        y = yp
    elif meta[0] == "reshape":
        y = yp.reshape(meta[1])
    else:  # "pad"
        y = yp[:, :meta[1][1]]

    # log|det J| = sum(log_scale): identical per row, independent of x — compute
    # once in f32 in the wrapper, no lane-width-1 output stream in the kernel.
    ldj = jnp.broadcast_to(jnp.sum(log_scale.astype(jnp.float32)), (B,))

    # Jacob is only assembled in PyTorch when NATIVE_GRADIENT=False (autograd path).
    return y, ldj, None


# --------------------------------------------------------------------------- #
# Base-class port (NATIVE_GRADIENT=True path).
# --------------------------------------------------------------------------- #
class AbstractInvertibleLayer:
    """JAX/Pallas port of the PyTorch AbstractInvertibleLayer (NATIVE_GRADIENT=True)."""

    event_dim = 0
    grad_mode = True
    invertible = True

    def __init__(self, dim):
        self.auxiliary_input = None
        self._cache = {'input': None, 'output': None, 'ldj': None, 'Jacob': None}
        k1, k2 = jax.random.split(jax.random.PRNGKey(42))
        self.log_scale = 0.1 * jax.random.normal(k1, (dim,), jnp.float32)
        self.shift = 0.1 * jax.random.normal(k2, (dim,), jnp.float32)

    # ---- base-class API -------------------------------------------------
    def set_auxiliary(self, auxiliary):
        self.auxiliary_input = auxiliary

    def set_gradient_mode_transform(self, mode=True):
        self.grad_mode = mode

    def forward_transform(self, x, auxiliary_input=None):
        # Abstract in the base class; concrete affine hot path runs in Pallas.
        return affine_forward_transform(x, self.log_scale, self.shift)

    def backward_transform(self, y, auxiliary_input=None, alpha=1.0):
        # Inverse of the affine map (plain-JAX glue, not the hot path).
        return (y - self.shift[None, :]) * jnp.exp(-self.log_scale[None, :])

    def log_abs_det_jacobian(self, x, y):
        if x is self._cache['input'] and self._cache['ldj'] is not None:
            ldj = self._cache['ldj']
        else:
            # ldj is independent of x for the elementwise-affine map: compute it
            # directly instead of launching a full forward pass just to drop y.
            ldj = jnp.broadcast_to(jnp.sum(self.log_scale.astype(jnp.float32)),
                                   (x.shape[0],))
        return ldj[..., None]  # torch .unsqueeze(-1)

    def inv(self, y):
        x = self.backward_transform(y, auxiliary_input=self.auxiliary_input)
        self._cache.update({'input': x, 'output': y, 'ldj': None})
        self.set_gradient_mode_transform(True)
        return x

    def _inverse(self, y):
        return self.inv(y)

    def __call__(self, x):
        if x is self._cache['input'] and self._cache['output'] is not None:
            return self._cache['output']
        out = self.forward_transform(x, auxiliary_input=self.auxiliary_input)
        y, ldj, Jacob = out
        # NATIVE_GRADIENT=True → no autograd Jacobian assembly in forward.
        # TODO(synk): JacobMult.backward's torch.solve path is backward-only and has
        # no forward-pass Pallas equivalent; its forward (like NegGrad) is identity.
        self._cache.update({'input': x, 'output': out, 'ldj': ldj, 'Jacob': Jacob})
        return out

    def clone_and_copy_data(self, x, y, Jacob):
        # jacob_mult forward returns x unchanged (Jacobian only used in backward).
        return x

    def erase_cache(self):
        self._cache = {k: None for k in self._cache}


# --------------------------------------------------------------------------- #
# Demo / correctness checks.
# --------------------------------------------------------------------------- #
if __name__ == "__main__":
    B, D = 8, 128
    key = jax.random.PRNGKey(0)
    x = jax.random.normal(key, (B, D), jnp.float32)

    layer = AbstractInvertibleLayer(D)

    # log_abs_det_jacobian on an uncached input (no kernel launch needed).
    ldj_col = layer.log_abs_det_jacobian(x, None)            # (B, 1)

    # __call__ path (caching semantics of the base class).
    y, ldj, jacob = layer(x)
    out2 = layer(x)                                          # cache hit → same object
    assert out2 is layer._cache['output']
    ldj_cached = layer.log_abs_det_jacobian(x, y)
    jax.block_until_ready((y, ldj_col, ldj, ldj_cached))

    # Correctness vs plain-JAX reference.
    y_ref = x * jnp.exp(layer.log_scale)[None, :] + layer.shift[None, :]
    assert jnp.allclose(y, y_ref, atol=1e-5, rtol=1e-5)
    assert jnp.allclose(ldj, jnp.sum(layer.log_scale), atol=1e-5)
    assert jnp.allclose(ldj_col[:, 0], jnp.sum(layer.log_scale), atol=1e-5)
    assert jnp.allclose(ldj_cached[:, 0], jnp.sum(layer.log_scale), atol=1e-5)

    # Invertibility sanity check.
    x_rec = layer.inv(y)
    assert jnp.allclose(x_rec, x, atol=1e-4, rtol=1e-4)

    # Multi-block grid path (grid = cdiv(24, 8) = 3 tiles).
    xg = jax.random.normal(jax.random.PRNGKey(1), (24, D), jnp.float32)
    yg, ldjg, _ = affine_forward_transform(xg, layer.log_scale, layer.shift, batch_tile=8)
    jax.block_until_ready(yg)
    yg_ref = xg * jnp.exp(layer.log_scale)[None, :] + layer.shift[None, :]
    assert jnp.allclose(yg, yg_ref, atol=1e-5, rtol=1e-5)
    assert jnp.allclose(ldjg, jnp.sum(layer.log_scale), atol=1e-5)

    # Lane-dense repacking path: D=32 divides 128 → rows folded into (B*D/128, 128).
    D2 = 32
    layer2 = AbstractInvertibleLayer(D2)
    x2 = jax.random.normal(jax.random.PRNGKey(2), (8, D2), jnp.float32)
    y2, ldj2, _ = layer2(x2)
    jax.block_until_ready(y2)
    y2_ref = x2 * jnp.exp(layer2.log_scale)[None, :] + layer2.shift[None, :]
    assert jnp.allclose(y2, y2_ref, atol=1e-5, rtol=1e-5)
    assert jnp.allclose(ldj2, jnp.sum(layer2.log_scale), atol=1e-5)

    # Padding path: D=50 (neither multiple of 128 nor divisor of 128).
    D3 = 50
    layer3 = AbstractInvertibleLayer(D3)
    x3 = jax.random.normal(jax.random.PRNGKey(3), (8, D3), jnp.float32)
    y3, ldj3, _ = layer3(x3)
    jax.block_until_ready(y3)
    y3_ref = x3 * jnp.exp(layer3.log_scale)[None, :] + layer3.shift[None, :]
    assert jnp.allclose(y3, y3_ref, atol=1e-5, rtol=1e-5)

    # Low-precision input path (exercises the explicit store cast).
    xb = jax.random.normal(jax.random.PRNGKey(4), (16, D), jnp.float32).astype(jnp.bfloat16)
    yb, _, _ = affine_forward_transform(xb, layer.log_scale, layer.shift)
    jax.block_until_ready(yb)
    yb_ref = (xb.astype(jnp.float32) * jnp.exp(layer.log_scale)[None, :]
              + layer.shift[None, :]).astype(jnp.bfloat16)
    assert jnp.allclose(yb.astype(jnp.float32), yb_ref.astype(jnp.float32),
                        atol=2e-2, rtol=2e-2)

    print("KERNEL_OK")
</pallas_src>

<mosaic_0001>
module attributes {stable_mosaic.version = 11 : i64} {
  func.func @_affine_forward_kernel(%arg0: i32, %arg1: memref<8x128xf32, #tpu.memory_space<vmem>>, %arg2: memref<1x128xf32, #tpu.memory_space<vmem>>, %arg3: memref<1x128xf32, #tpu.memory_space<vmem>>, %arg4: memref<8x128xf32, #tpu.memory_space<vmem>>) attributes {dimension_semantics = [#tpu.dimension_semantics<parallel>], iteration_bounds = array<i64: 1>, scalar_prefetch = 0 : i64, scratch_operands = 0 : i64, tpu.core_type = #tpu.core_type<tc>, window_params = [{transform_indices = @transform_0, window_bounds = array<i64: 8, 128>}, {pipeline_mode = #tpu.pipeline_mode<synchronous>, transform_indices = @transform_1, window_bounds = array<i64: 1, 128>}, {pipeline_mode = #tpu.pipeline_mode<synchronous>, transform_indices = @transform_2, window_bounds = array<i64: 1, 128>}, {transform_indices = @transform_3, window_bounds = array<i64: 8, 128>}]} {
    %c0 = arith.constant 0 : index
    %c0_0 = arith.constant 0 : index
    %0 = vector.load %arg1[%c0, %c0_0] : memref<8x128xf32, #tpu.memory_space<vmem>>, vector<8x128xf32>
    %c0_1 = arith.constant 0 : index
    %c0_2 = arith.constant 0 : index
    %1 = vector.load %arg2[%c0_1, %c0_2] : memref<1x128xf32, #tpu.memory_space<vmem>>, vector<1x128xf32>
    %2 = math.exp %1 : vector<1x128xf32>
    %3 = vector.broadcast %2 : vector<1x128xf32> to vector<8x128xf32>
    %4 = arith.mulf %0, %3 : vector<8x128xf32>
    %c0_3 = arith.constant 0 : index
    %c0_4 = arith.constant 0 : index
    %5 = vector.load %arg3[%c0_3, %c0_4] : memref<1x128xf32, #tpu.memory_space<vmem>>, vector<1x128xf32>
    %6 = vector.broadcast %5 : vector<1x128xf32> to vector<8x128xf32>
    %7 = arith.addf %4, %6 : vector<8x128xf32>
    %c0_5 = arith.constant 0 : index
    %c0_6 = arith.constant 0 : index
    %8 = vector.load %arg4[%c0_5, %c0_6] : memref<8x128xf32, #tpu.memory_space<vmem>>, vector<8x128xf32>
    tpu.vector_store %arg4[%c0_5, %c0_6], %7 {strides = array<i32>} : memref<8x128xf32, #tpu.memory_space<vmem>>, vector<8x128xf32>,
    return
  }
  func.func @transform_0(%arg0: i32) -> (i32, i32) {
    %c0_i32 = arith.constant 0 : i32
    %c0_i32_0 = arith.constant 0 : i32
    return %arg0, %c0_i32 : i32, i32
  }
  func.func @transform_1(%arg0: i32) -> (i32, i32) {
    %c0_i32 = arith.constant 0 : i32
    %c0_i32_0 = arith.constant 0 : i32
    %c0_i32_1 = arith.constant 0 : i32
    return %c0_i32, %c0_i32_0 : i32, i32
  }
  func.func @transform_2(%arg0: i32) -> (i32, i32) {
    %c0_i32 = arith.constant 0 : i32
    %c0_i32_0 = arith.constant 0 : i32
    %c0_i32_1 = arith.constant 0 : i32
    return %c0_i32, %c0_i32_0 : i32, i32
  }
  func.func @transform_3(%arg0: i32) -> (i32, i32) {
    %c0_i32 = arith.constant 0 : i32
    %c0_i32_0 = arith.constant 0 : i32
    return %arg0, %c0_i32 : i32, i32
  }
}

</mosaic_0001>

<bundles_post_ra>
// kernel: affine_forward_transform.1
= control target key start
LH: loop header
LB: loop body
LE: loop exit
PB: predicated region body
PF: predicated region fallthrough
CT: control target
= control target key end

     0   :  { %8 = vsyncpa [#allocation3], 0  ;;  %s151_s0 = inlined_call_operand.hbm [shape: f32[8,128], index: 0, kind: input, shape index: {}]   ;;  %s152_s1 = inlined_call_operand.vmem [shape: f32[1,128], index: 1, kind: input, shape index: {}]   ;;  %s153_s2 = inlined_call_operand.vmem [shape: f32[1,128], index: 2, kind: input, shape index: {}]   ;;  %s154_s3 = inlined_call_operand.hbm [shape: f32[8,128], index: 3, kind: output, shape index: {}]  }
   0x1   :  { %9 = vsyncpa [#allocation4], 0  ;;  %s15_s14 = sshll.u32 %s151_s0, 4  ;;  %s117_s15 = smov [#allocation2]   ;;  %s16_s14 = int_to_ptr.hbm [resolvable:$true] %s15_s14 }
   0x2   :  { %s17_s16 = sshll.u32 %s117_s15, 4  ;;  %s18_s16 = int_to_ptr.vmem [resolvable:$true] %s17_s16 }
   0x3   :  { %20 = dma.hbm_to_vmem [thread:$0]  %s16_s14, 128, %s18_s16, [#allocation3]  }
   0x4   :  { %113 = dma.done.wait [#allocation3], 128  }
   0x5   :  { %114 = vsyncadd [#allocation3], 4294967168  ;;  %v30_v0 = vld [vmem:[%s152_s1] sm:$0x1]  ;;  %s118_s0 = smov [#allocation5]   ;;  %s50_s24 = sshll.u32 %s154_s3, 4  ;;  %s51_s24 = int_to_ptr.hbm [resolvable:$true] %s50_s24 }
   0x6   :  { %v31_v1 = vmul.f32 1.442695, %v30_v0  ;;  %v29_v3 = vld [vmem:[#allocation2] sm:$0xff]  ;;  %s48_s21 = sshll.u32 %s118_s0, 4  ;;  %s49_s21 = int_to_ptr.vmem [resolvable:$true] %s48_s21 }
   0x7   :  { %v62_v5 = vld [vmem:[%s153_s2] ss:$0 sm:$0xff] }
   0x8   :  { %63 = vpow2.f32 %v31_v1 }
   0xe   :  { %v64_v2 = vpop.eup %63 }
   0xf   :  { %v34_v4 = vperm.slane %v64_v2, 0 }
  0x11   :  { %v36_v6 = vmul.f32 %v34_v4, %v29_v3 }
  0x13   :  { %v41_v7 = vadd.f32 %v62_v5, %v36_v6 }
  0x15   :  { %42 = vst [vmem:[#allocation5] sm:$0xff] %v41_v7 }
  0x16   :  { %53 = dma.vmem_to_hbm [thread:$0]  %s49_s21, 128, %s51_s24, [#allocation4]  }
  0x17   :  { %115 = dma.done.wait [#allocation4], 128  }
  0x18   :  { %116 = vsyncadd [#allocation4], 4294967168 }
  0x19   :  { %58 = vsyncpa [#allocation3], 1 }
  0x1a   :  { %59 = vsyncpa [#allocation4], 1 }

</bundles_post_ra>
